<compile_context>
chip_gen: v7x
topology: tpu7x:2x2x1
jax: 0.10.0
libtpu: 0.0.40
codegen_flags: <defaults>
</compile_context>

<pallas_src>
import jax
import jax.numpy as jnp
from jax.experimental import pallas as pl
from jax.experimental.pallas import tpu as pltpu

_MAX_UNROLL_STEPS = 32   # static full unroll up to this length; rolled fori_loop above


# ----------------------------------------------------------------------------- kernel
def _rnn_seq_kernel(x_ref, h0_ref, w_ih_t_ref, w_hh_t_ref, b_ref,
                    w_fc_ref, b_fc_ref,
                    pred_ref, out_ref,
                    xw_ref):
    """Full-sequence Elman RNN + linear head in one kernel invocation.

    Shapes (batch folded to 1 by the wrapper):
      x_ref      : (seq_len, input_size)   f32
      h0_ref     : (1, hidden)             f32
      w_ih_t_ref : (input_size, hidden)    f32
      w_hh_t_ref : (hidden, hidden)        bf16   [R2]
      b_ref      : (1, hidden)             f32    (b_ih + b_hh, pre-combined)
      w_fc_ref   : (output_size, hidden)   f32
      b_fc_ref   : (output_size, 1)        f32
      pred_ref   : (output_size, seq_len)  f32    (lane-dense output, [R5])
      out_ref    : (seq_len, hidden)       f32
      xw_ref     : (seq_len, hidden)       f32 VMEM scratch
    """
    seq_len = x_ref.shape[0]

    # Phase 1 (time-parallel, off the serial chain): project every timestep through
    # W_ih in ONE MXU matmul and park the result in VMEM scratch.
    xw_ref[...] = (jnp.dot(x_ref[...], w_ih_t_ref[...],
                           preferred_element_type=jnp.float32) + b_ref[...])

    w_hh_bf = w_hh_t_ref[...]            # (H, H) bf16, loaded once, reused every step
    h0 = h0_ref[...]                     # (1, H) f32

    def step(h, xw_t):
        # Only this dot + add + tanh sit on the sequential critical path.
        pre = xw_t + jnp.dot(h.astype(jnp.bfloat16), w_hh_bf,
                             preferred_element_type=jnp.float32)
        return jnp.tanh(pre)             # f32 on the EUP

    if seq_len <= _MAX_UNROLL_STEPS:
        # Phase 2a: fully unrolled at trace time (static indices everywhere).
        h = h0
        for t in range(seq_len):
            h = step(h, xw_ref[t:t + 1, :])
            out_ref[t:t + 1, :] = h      # [R1] per-step row store; no list, no concat
    else:
        # Phase 2b: rolled recurrence — code size independent of seq_len.  [R6]
        def body(t, h):
            h = step(h, xw_ref[pl.ds(t, 1), :])
            out_ref[pl.ds(t, 1), :] = h
            return h
        jax.lax.fori_loop(0, seq_len, body, h0, unroll=8)

    # Phase 3 (time-parallel): fc head over the whole sequence in one NT matmul,
    # emitted lane-dense as (output_size, seq_len).  [R5]
    outs = out_ref[...]                                          # (S, H)
    pred_ref[...] = (jax.lax.dot_general(
        w_fc_ref[...], outs,
        dimension_numbers=(((1,), (1,)), ((), ())),              # contract over hidden
        preferred_element_type=jnp.float32) + b_fc_ref[...])     # (O, S)


# ----------------------------------------------------------------------------- param prep (cached)
def prepare_rnn_params(w_ih, w_hh, b_ih, b_hh, w_fc, b_fc):
    """One-time parameter prep [R4]: transposes, bias combine, bf16 cast of W_hh^T."""
    w_ih_t = jnp.asarray(w_ih, jnp.float32).T                               # (I, H)
    w_hh_t_bf16 = jnp.asarray(w_hh, jnp.float32).T.astype(jnp.bfloat16)     # (H, H)
    b_comb = (jnp.asarray(b_ih, jnp.float32)
              + jnp.asarray(b_hh, jnp.float32)).reshape(1, -1)              # (1, H)
    w_fc2 = jnp.asarray(w_fc, jnp.float32)                                  # (O, H)
    b_fc_col = jnp.asarray(b_fc, jnp.float32).reshape(-1, 1)                # (O, 1)
    return w_ih_t, w_hh_t_bf16, b_comb, w_fc2, b_fc_col


# ----------------------------------------------------------------------------- wrapper
@jax.jit
def rnn_state_forward(x, h0, w_ih_t, w_hh_t_bf16, b_comb, w_fc, b_fc_col):
    """Run the RNN + fc head over the full sequence with ONE pallas_call.

    x  : (seq_len, batch, input_size) f32   (batch must be 1, as .view(seq_len) implies)
    h0 : (batch, hidden) f32
    Remaining args come pre-prepared from prepare_rnn_params (cached once).
    Returns (prediction (S,B,O), output (S,B,H)).
    """
    seq_len, batch, input_size = x.shape
    assert batch == 1, "RNNState forward requires batch == 1 (.view(seq_len))"
    hidden = w_hh_t_bf16.shape[0]
    output_size = w_fc.shape[0]

    x2d = jnp.asarray(x, jnp.float32).reshape(seq_len, input_size)
    h0_2d = jnp.asarray(h0, jnp.float32).reshape(1, hidden)

    vmem = pl.BlockSpec(memory_space=pltpu.MemorySpace.VMEM)

    pred_os, out2d = pl.pallas_call(
        _rnn_seq_kernel,
        out_shape=(
            jax.ShapeDtypeStruct((output_size, seq_len), jnp.float32),   # lane-dense pred
            jax.ShapeDtypeStruct((seq_len, hidden), jnp.float32),
        ),
        # No grid: everything is a full VMEM-resident block, single invocation.
        in_specs=[vmem] * 7,
        out_specs=(vmem, vmem),
        scratch_shapes=[pltpu.VMEM((seq_len, hidden), jnp.float32)],     # xw scratch
    )(x2d, h0_2d, w_ih_t, w_hh_t_bf16, b_comb, w_fc, b_fc_col)

    pred = pred_os.T.reshape(seq_len, batch, output_size)
    out = out2d.reshape(seq_len, batch, hidden)
    return pred, out


# ----------------------------------------------------------------------------- module emulation
class RNNStatePallas:
    """JAX/Pallas re-implementation of the PyTorch `RNNState` forward pass.

    Restricted (as the original forward implicitly requires for `.view(seq_len)`):
      number_recurrent_layers = 1, num_directions = 1, batch = 1, output_size = 1,
      nonlinearity = 'tanh'.  Dropout is a no-op for a single layer; .detach() is
      autograd-only and a forward no-op.
    """

    def __init__(self, input_size, hiddenstate_size, seq_len, batch, output_size, key):
        self.input_size = 2 * input_size + 2 * input_size   # == 4 * input_size
        self.hiddenstate_size = hiddenstate_size
        self.seq_len = seq_len
        self.batch = batch
        self.output_size = output_size

        k = 1.0 / jnp.sqrt(jnp.float32(hiddenstate_size))
        keys = jax.random.split(key, 6)
        u = lambda kk, shape: jax.random.uniform(kk, shape, jnp.float32, -k, k)
        # nn.RNN parameters (layer 0) + nn.Linear parameters, deterministic init.
        self.w_ih = u(keys[0], (hiddenstate_size, self.input_size))
        self.w_hh = u(keys[1], (hiddenstate_size, hiddenstate_size))
        self.b_ih = u(keys[2], (hiddenstate_size,))
        self.b_hh = u(keys[3], (hiddenstate_size,))
        self.w_fc = u(keys[4], (output_size, hiddenstate_size))
        self.b_fc = u(keys[5], (output_size,))

        # [R4] kernel-layout parameters cached once (no per-call transposes/casts).
        self._params = prepare_rnn_params(self.w_ih, self.w_hh, self.b_ih, self.b_hh,
                                          self.w_fc, self.b_fc)

        # hiddenstate: (num_layers * num_directions, batch, hidden) == (1, batch, hidden)
        self.hiddenstate = jnp.zeros((1, batch, hiddenstate_size), jnp.float32)

    def forward(self, inp, type):
        x = inp.reshape(self.seq_len, self.batch, self.input_size)
        h0 = self.hiddenstate[0]                                   # (batch, hidden)
        pred, out = rnn_state_forward(x, h0, *self._params)
        self.output = out                                          # (seq_len, batch, hidden)
        self.prediction = pred.reshape(self.seq_len)               # .view(self.seq_len)
        if type == 'old':
            # Reproduces: self.hiddenstate = self.output[0].view(1, batch, hidden)
            self.hiddenstate = out[0].reshape(1, self.batch, self.hiddenstate_size)
        else:
            # 'new': hiddenstatenew is stored but self.hiddenstate is left untouched.
            self.hiddenstatenew = out[-1].reshape(1, self.batch, self.hiddenstate_size)
        return self.prediction


# ----------------------------------------------------------------------------- references (plain JAX)
def _reference_f32(x, h0, w_ih, w_hh, b_ih, b_hh, w_fc, b_fc):
    """True fp32 semantics of the PyTorch module."""
    def step(h, x_t):
        h_new = jnp.tanh(x_t @ w_ih.T + h @ w_hh.T + b_ih + b_hh)
        return h_new, h_new
    _, outs = jax.lax.scan(step, h0, x)
    pred = outs @ w_fc.T + b_fc
    return pred, outs


def _reference_bf16(x, h0, w_ih, w_hh, b_ih, b_hh, w_fc, b_fc):
    """Mirror of the kernel's numerics: bf16 operands on the recurrence dot only."""
    w_hh_t_bf = jnp.asarray(w_hh, jnp.float32).T.astype(jnp.bfloat16)
    b = b_ih + b_hh
    def step(h, x_t):
        pre = x_t @ w_ih.T + b + jnp.dot(h.astype(jnp.bfloat16), w_hh_t_bf,
                                         preferred_element_type=jnp.float32)
        h_new = jnp.tanh(pre)
        return h_new, h_new
    _, outs = jax.lax.scan(step, h0, x)
    pred = outs @ w_fc.T + b_fc
    return pred, outs


# ----------------------------------------------------------------------------- main
if __name__ == "__main__":
    key = jax.random.PRNGKey(0)
    k_param, k_in, k_param2, k_in2 = jax.random.split(key, 4)

    # Small shapes consistent with the module's implicit constraints.
    base_input_size = 4           # module uses 4 * input_size = 16 features
    hidden = 32
    seq_len = 8
    batch = 1                     # .view(seq_len) forces batch * output_size == 1
    output_size = 1

    model = RNNStatePallas(base_input_size, hidden, seq_len, batch, output_size, k_param)
    inp = jax.random.normal(k_in, (seq_len, batch, model.input_size), jnp.float32)

    # 'new' pass (does not update hidden state), then 'old' pass (updates it).
    pred_new = model.forward(inp, 'new')
    out_new = model.output
    pred_old = model.forward(inp, 'old')
    jax.block_until_ready((pred_new, pred_old, out_new, model.hiddenstate))

    x3d = inp.reshape(seq_len, batch, model.input_size)
    h0 = jnp.zeros((batch, hidden), jnp.float32)
    ref_pred_f32, ref_out_f32 = _reference_f32(x3d, h0, model.w_ih, model.w_hh,
                                               model.b_ih, model.b_hh,
                                               model.w_fc, model.b_fc)
    ref_pred_bf, ref_out_bf = _reference_bf16(x3d, h0, model.w_ih, model.w_hh,
                                              model.b_ih, model.b_hh,
                                              model.w_fc, model.b_fc)

    # Tight check against a reference that mirrors the kernel's bf16 recurrence numerics.
    assert jnp.allclose(pred_new, ref_pred_bf.reshape(seq_len), atol=1e-3, rtol=1e-3)
    assert jnp.allclose(out_new, ref_out_bf, atol=1e-3, rtol=1e-3)
    assert jnp.allclose(model.hiddenstate,
                        ref_out_bf[0].reshape(1, batch, hidden), atol=1e-3, rtol=1e-3)
    # Looser check against the true fp32 semantics (bf16 recurrence operands, per review).
    assert jnp.allclose(pred_new, ref_pred_f32.reshape(seq_len), atol=2e-2, rtol=2e-2)
    assert jnp.allclose(pred_old, ref_pred_f32.reshape(seq_len), atol=2e-2, rtol=2e-2)
    assert jnp.allclose(out_new, ref_out_f32, atol=2e-2, rtol=2e-2)

    # --- long-sequence path: exercises the in-kernel fori_loop recurrence [R6] ---
    seq_len_l = 40
    in_size_l = 16
    kw = jax.random.split(k_param2, 6)
    kscale = 1.0 / jnp.sqrt(jnp.float32(hidden))
    u = lambda kk, shape: jax.random.uniform(kk, shape, jnp.float32, -kscale, kscale)
    w_ih_l = u(kw[0], (hidden, in_size_l)); w_hh_l = u(kw[1], (hidden, hidden))
    b_ih_l = u(kw[2], (hidden,));           b_hh_l = u(kw[3], (hidden,))
    w_fc_l = u(kw[4], (output_size, hidden)); b_fc_l = u(kw[5], (output_size,))
    params_l = prepare_rnn_params(w_ih_l, w_hh_l, b_ih_l, b_hh_l, w_fc_l, b_fc_l)
    x_l = jax.random.normal(k_in2, (seq_len_l, 1, in_size_l), jnp.float32)
    h0_l = jnp.zeros((1, hidden), jnp.float32)

    pred_l, out_l = rnn_state_forward(x_l, h0_l, *params_l)
    jax.block_until_ready((pred_l, out_l))
    ref_pred_l, ref_out_l = _reference_bf16(x_l, h0_l, w_ih_l, w_hh_l,
                                            b_ih_l, b_hh_l, w_fc_l, b_fc_l)
    assert jnp.allclose(pred_l, ref_pred_l, atol=2e-2, rtol=2e-2)
    assert jnp.allclose(out_l, ref_out_l, atol=2e-2, rtol=2e-2)

    print("KERNEL_OK")
</pallas_src>

<mosaic_0001>
module attributes {stable_mosaic.version = 11 : i64} {
  func.func @_rnn_seq_kernel(%arg0: memref<8x16xf32, #tpu.memory_space<vmem>>, %arg1: memref<1x32xf32, #tpu.memory_space<vmem>>, %arg2: memref<16x32xf32, #tpu.memory_space<vmem>>, %arg3: memref<32x32xbf16, #tpu.memory_space<vmem>>, %arg4: memref<1x32xf32, #tpu.memory_space<vmem>>, %arg5: memref<1x32xf32, #tpu.memory_space<vmem>>, %arg6: memref<1x1xf32, #tpu.memory_space<vmem>>, %arg7: memref<1x8xf32, #tpu.memory_space<vmem>>, %arg8: memref<8x32xf32, #tpu.memory_space<vmem>>, %arg9: memref<8x32xf32, #tpu.memory_space<vmem>>) attributes {dimension_semantics = [], scalar_prefetch = 0 : i64, scratch_operands = 1 : i64, tpu.core_type = #tpu.core_type<tc>} {
    %c0 = arith.constant 0 : index
    %c0_0 = arith.constant 0 : index
    %0 = vector.load %arg0[%c0, %c0_0] : memref<8x16xf32, #tpu.memory_space<vmem>>, vector<8x16xf32>
    %c0_1 = arith.constant 0 : index
    %c0_2 = arith.constant 0 : index
    %1 = vector.load %arg2[%c0_1, %c0_2] : memref<16x32xf32, #tpu.memory_space<vmem>>, vector<16x32xf32>
    %cst = arith.constant dense<0.000000e+00> : vector<8x32xf32>
    %2 = tpu.matmul %0, %1, %cst {dimension_numbers = #tpu.dot_dimension_numbers<[1], [0], [0], [1], [0, 0, 1, 1], [], []>} : vector<8x16xf32>, vector<16x32xf32>, vector<8x32xf32> -> vector<8x32xf32>
    %c0_3 = arith.constant 0 : index
    %c0_4 = arith.constant 0 : index
    %3 = vector.load %arg4[%c0_3, %c0_4] : memref<1x32xf32, #tpu.memory_space<vmem>>, vector<1x32xf32>
    %4 = vector.broadcast %3 : vector<1x32xf32> to vector<8x32xf32>
    %5 = arith.addf %2, %4 : vector<8x32xf32>
    %c0_5 = arith.constant 0 : index
    %c0_6 = arith.constant 0 : index
    %6 = vector.load %arg9[%c0_5, %c0_6] : memref<8x32xf32, #tpu.memory_space<vmem>>, vector<8x32xf32>
    tpu.vector_store %arg9[%c0_5, %c0_6], %5 {strides = array<i32>} : memref<8x32xf32, #tpu.memory_space<vmem>>, vector<8x32xf32>,
    %c0_7 = arith.constant 0 : index
    %c0_8 = arith.constant 0 : index
    %7 = vector.load %arg3[%c0_7, %c0_8] : memref<32x32xbf16, #tpu.memory_space<vmem>>, vector<32x32xbf16>
    %c0_9 = arith.constant 0 : index
    %c0_10 = arith.constant 0 : index
    %8 = vector.load %arg1[%c0_9, %c0_10] : memref<1x32xf32, #tpu.memory_space<vmem>>, vector<1x32xf32>
    %c0_11 = arith.constant 0 : index
    %c0_12 = arith.constant 0 : index
    %9 = vector.load %arg9[%c0_11, %c0_12] : memref<8x32xf32, #tpu.memory_space<vmem>>, vector<1x32xf32>
    %10 = arith.truncf %8 : vector<1x32xf32> to vector<1x32xbf16>
    %cst_13 = arith.constant dense<0.000000e+00> : vector<1x32xf32>
    %11 = tpu.matmul %10, %7, %cst_13 {dimension_numbers = #tpu.dot_dimension_numbers<[1], [0], [0], [1], [0, 0, 1, 1], [], []>} : vector<1x32xbf16>, vector<32x32xbf16>, vector<1x32xf32> -> vector<1x32xf32>
    %12 = arith.addf %9, %11 : vector<1x32xf32>
    %13 = math.tanh %12 : vector<1x32xf32>
    %c0_14 = arith.constant 0 : index
    %c0_15 = arith.constant 0 : index
    %14 = vector.load %arg8[%c0_14, %c0_15] : memref<8x32xf32, #tpu.memory_space<vmem>>, vector<1x32xf32>
    tpu.vector_store %arg8[%c0_14, %c0_15], %13 {strides = array<i32>} : memref<8x32xf32, #tpu.memory_space<vmem>>, vector<1x32xf32>,
    %c1 = arith.constant 1 : index
    %c0_16 = arith.constant 0 : index
    %15 = vector.load %arg9[%c1, %c0_16] : memref<8x32xf32, #tpu.memory_space<vmem>>, vector<1x32xf32>
    %16 = arith.truncf %13 : vector<1x32xf32> to vector<1x32xbf16>
    %cst_17 = arith.constant dense<0.000000e+00> : vector<1x32xf32>
    %17 = tpu.matmul %16, %7, %cst_17 {dimension_numbers = #tpu.dot_dimension_numbers<[1], [0], [0], [1], [0, 0, 1, 1], [], []>} : vector<1x32xbf16>, vector<32x32xbf16>, vector<1x32xf32> -> vector<1x32xf32>
    %18 = arith.addf %15, %17 : vector<1x32xf32>
    %19 = math.tanh %18 : vector<1x32xf32>
    %c1_18 = arith.constant 1 : index
    %c0_19 = arith.constant 0 : index
    %20 = vector.load %arg8[%c1_18, %c0_19] : memref<8x32xf32, #tpu.memory_space<vmem>>, vector<1x32xf32>
    tpu.vector_store %arg8[%c1_18, %c0_19], %19 {strides = array<i32>} : memref<8x32xf32, #tpu.memory_space<vmem>>, vector<1x32xf32>,
    %c2 = arith.constant 2 : index
    %c0_20 = arith.constant 0 : index
    %21 = vector.load %arg9[%c2, %c0_20] : memref<8x32xf32, #tpu.memory_space<vmem>>, vector<1x32xf32>
    %22 = arith.truncf %19 : vector<1x32xf32> to vector<1x32xbf16>
    %cst_21 = arith.constant dense<0.000000e+00> : vector<1x32xf32>
    %23 = tpu.matmul %22, %7, %cst_21 {dimension_numbers = #tpu.dot_dimension_numbers<[1], [0], [0], [1], [0, 0, 1, 1], [], []>} : vector<1x32xbf16>, vector<32x32xbf16>, vector<1x32xf32> -> vector<1x32xf32>
    %24 = arith.addf %21, %23 : vector<1x32xf32>
    %25 = math.tanh %24 : vector<1x32xf32>
    %c2_22 = arith.constant 2 : index
    %c0_23 = arith.constant 0 : index
    %26 = vector.load %arg8[%c2_22, %c0_23] : memref<8x32xf32, #tpu.memory_space<vmem>>, vector<1x32xf32>
    tpu.vector_store %arg8[%c2_22, %c0_23], %25 {strides = array<i32>} : memref<8x32xf32, #tpu.memory_space<vmem>>, vector<1x32xf32>,
    %c3 = arith.constant 3 : index
    %c0_24 = arith.constant 0 : index
    %27 = vector.load %arg9[%c3, %c0_24] : memref<8x32xf32, #tpu.memory_space<vmem>>, vector<1x32xf32>
    %28 = arith.truncf %25 : vector<1x32xf32> to vector<1x32xbf16>
    %cst_25 = arith.constant dense<0.000000e+00> : vector<1x32xf32>
    %29 = tpu.matmul %28, %7, %cst_25 {dimension_numbers = #tpu.dot_dimension_numbers<[1], [0], [0], [1], [0, 0, 1, 1], [], []>} : vector<1x32xbf16>, vector<32x32xbf16>, vector<1x32xf32> -> vector<1x32xf32>
    %30 = arith.addf %27, %29 : vector<1x32xf32>
    %31 = math.tanh %30 : vector<1x32xf32>
    %c3_26 = arith.constant 3 : index
    %c0_27 = arith.constant 0 : index
    %32 = vector.load %arg8[%c3_26, %c0_27] : memref<8x32xf32, #tpu.memory_space<vmem>>, vector<1x32xf32>
    tpu.vector_store %arg8[%c3_26, %c0_27], %31 {strides = array<i32>} : memref<8x32xf32, #tpu.memory_space<vmem>>, vector<1x32xf32>,
    %c4 = arith.constant 4 : index
    %c0_28 = arith.constant 0 : index
    %33 = vector.load %arg9[%c4, %c0_28] : memref<8x32xf32, #tpu.memory_space<vmem>>, vector<1x32xf32>
    %34 = arith.truncf %31 : vector<1x32xf32> to vector<1x32xbf16>
    %cst_29 = arith.constant dense<0.000000e+00> : vector<1x32xf32>
    %35 = tpu.matmul %34, %7, %cst_29 {dimension_numbers = #tpu.dot_dimension_numbers<[1], [0], [0], [1], [0, 0, 1, 1], [], []>} : vector<1x32xbf16>, vector<32x32xbf16>, vector<1x32xf32> -> vector<1x32xf32>
    %36 = arith.addf %33, %35 : vector<1x32xf32>
    %37 = math.tanh %36 : vector<1x32xf32>
    %c4_30 = arith.constant 4 : index
    %c0_31 = arith.constant 0 : index
    %38 = vector.load %arg8[%c4_30, %c0_31] : memref<8x32xf32, #tpu.memory_space<vmem>>, vector<1x32xf32>
    tpu.vector_store %arg8[%c4_30, %c0_31], %37 {strides = array<i32>} : memref<8x32xf32, #tpu.memory_space<vmem>>, vector<1x32xf32>,
    %c5 = arith.constant 5 : index
    %c0_32 = arith.constant 0 : index
    %39 = vector.load %arg9[%c5, %c0_32] : memref<8x32xf32, #tpu.memory_space<vmem>>, vector<1x32xf32>
    %40 = arith.truncf %37 : vector<1x32xf32> to vector<1x32xbf16>
    %cst_33 = arith.constant dense<0.000000e+00> : vector<1x32xf32>
    %41 = tpu.matmul %40, %7, %cst_33 {dimension_numbers = #tpu.dot_dimension_numbers<[1], [0], [0], [1], [0, 0, 1, 1], [], []>} : vector<1x32xbf16>, vector<32x32xbf16>, vector<1x32xf32> -> vector<1x32xf32>
    %42 = arith.addf %39, %41 : vector<1x32xf32>
    %43 = math.tanh %42 : vector<1x32xf32>
    %c5_34 = arith.constant 5 : index
    %c0_35 = arith.constant 0 : index
    %44 = vector.load %arg8[%c5_34, %c0_35] : memref<8x32xf32, #tpu.memory_space<vmem>>, vector<1x32xf32>
    tpu.vector_store %arg8[%c5_34, %c0_35], %43 {strides = array<i32>} : memref<8x32xf32, #tpu.memory_space<vmem>>, vector<1x32xf32>,
    %c6 = arith.constant 6 : index
    %c0_36 = arith.constant 0 : index
    %45 = vector.load %arg9[%c6, %c0_36] : memref<8x32xf32, #tpu.memory_space<vmem>>, vector<1x32xf32>
    %46 = arith.truncf %43 : vector<1x32xf32> to vector<1x32xbf16>
    %cst_37 = arith.constant dense<0.000000e+00> : vector<1x32xf32>
    %47 = tpu.matmul %46, %7, %cst_37 {dimension_numbers = #tpu.dot_dimension_numbers<[1], [0], [0], [1], [0, 0, 1, 1], [], []>} : vector<1x32xbf16>, vector<32x32xbf16>, vector<1x32xf32> -> vector<1x32xf32>
    %48 = arith.addf %45, %47 : vector<1x32xf32>
    %49 = math.tanh %48 : vector<1x32xf32>
    %c6_38 = arith.constant 6 : index
    %c0_39 = arith.constant 0 : index
    %50 = vector.load %arg8[%c6_38, %c0_39] : memref<8x32xf32, #tpu.memory_space<vmem>>, vector<1x32xf32>
    tpu.vector_store %arg8[%c6_38, %c0_39], %49 {strides = array<i32>} : memref<8x32xf32, #tpu.memory_space<vmem>>, vector<1x32xf32>,
    %c7 = arith.constant 7 : index
    %c0_40 = arith.constant 0 : index
    %51 = vector.load %arg9[%c7, %c0_40] : memref<8x32xf32, #tpu.memory_space<vmem>>, vector<1x32xf32>
    %52 = arith.truncf %49 : vector<1x32xf32> to vector<1x32xbf16>
    %cst_41 = arith.constant dense<0.000000e+00> : vector<1x32xf32>
    %53 = tpu.matmul %52, %7, %cst_41 {dimension_numbers = #tpu.dot_dimension_numbers<[1], [0], [0], [1], [0, 0, 1, 1], [], []>} : vector<1x32xbf16>, vector<32x32xbf16>, vector<1x32xf32> -> vector<1x32xf32>
    %54 = arith.addf %51, %53 : vector<1x32xf32>
    %55 = math.tanh %54 : vector<1x32xf32>
    %c7_42 = arith.constant 7 : index
    %c0_43 = arith.constant 0 : index
    %56 = vector.load %arg8[%c7_42, %c0_43] : memref<8x32xf32, #tpu.memory_space<vmem>>, vector<1x32xf32>
    tpu.vector_store %arg8[%c7_42, %c0_43], %55 {strides = array<i32>} : memref<8x32xf32, #tpu.memory_space<vmem>>, vector<1x32xf32>,
    %c0_44 = arith.constant 0 : index
    %c0_45 = arith.constant 0 : index
    %57 = vector.load %arg8[%c0_44, %c0_45] : memref<8x32xf32, #tpu.memory_space<vmem>>, vector<8x32xf32>
    %c0_46 = arith.constant 0 : index
    %c0_47 = arith.constant 0 : index
    %58 = vector.load %arg5[%c0_46, %c0_47] : memref<1x32xf32, #tpu.memory_space<vmem>>, vector<1x32xf32>
    %cst_48 = arith.constant dense<0.000000e+00> : vector<1x8xf32>
    %59 = tpu.matmul %58, %57, %cst_48 {dimension_numbers = #tpu.dot_dimension_numbers<[1], [1], [0], [0], [0, 0, 1, 0], [], []>} : vector<1x32xf32>, vector<8x32xf32>, vector<1x8xf32> -> vector<1x8xf32>
    %c0_49 = arith.constant 0 : index
    %c0_50 = arith.constant 0 : index
    %60 = vector.load %arg6[%c0_49, %c0_50] : memref<1x1xf32, #tpu.memory_space<vmem>>, vector<1x1xf32>
    %61 = vector.broadcast %60 : vector<1x1xf32> to vector<1x8xf32>
    %62 = arith.addf %59, %61 : vector<1x8xf32>
    %c0_51 = arith.constant 0 : index
    %c0_52 = arith.constant 0 : index
    %63 = vector.load %arg7[%c0_51, %c0_52] : memref<1x8xf32, #tpu.memory_space<vmem>>, vector<1x8xf32>
    tpu.vector_store %arg7[%c0_51, %c0_52], %62 {strides = array<i32>} : memref<1x8xf32, #tpu.memory_space<vmem>>, vector<1x8xf32>,
    return
  }
}

</mosaic_0001>

<bundles_post_ra>
// kernel: rnn_state_forward.1
= control target key start
LH: loop header
LB: loop body
LE: loop exit
PB: predicated region body
PF: predicated region fallthrough
CT: control target
= control target key end

     0   :  { %s1118_s0 = inlined_call_operand.hbm [shape: f32[8,16], index: 0, kind: input, shape index: {}]   ;;  %s1119_s1 = inlined_call_operand.vmem [shape: f32[1,32], index: 1, kind: input, shape index: {}]   ;;  %s1120_s2 = inlined_call_operand.hbm [shape: f32[16,32], index: 2, kind: input, shape index: {}]   ;;  %s1121_s3 = inlined_call_operand.vmem [shape: bf16[32,32], index: 3, kind: input, shape index: {}]   ;;  %s1122_s4 = inlined_call_operand.vmem [shape: f32[1,32], index: 4, kind: input, shape index: {}]   ;;  %s1123_s5 = inlined_call_operand.vmem [shape: f32[1,32], index: 5, kind: input, shape index: {}]   ;;  %s1124_s6 = inlined_call_operand.<no memory space> [shape: f32[1,1], index: 6, kind: input, shape index: {}]   ;;  %s1125_s7 = inlined_call_operand.hbm [shape: f32[1,8], index: 7, kind: output, shape index: {0}]   ;;  %s1126_s8 = inlined_call_operand.hbm [shape: f32[8,32], index: 8, kind: output, shape index: {1}]  }
   0x1   :  { %v14_v0 = vstv %s1124_s6 }
   0x2   :  { %15 = vst [vmem:[#allocation3] sm:$0x1] %v14_v0 }
   0x3   :  { %16 = vsyncpa [#allocation5], 0 }
   0x4   :  { %17 = vsyncpa [#allocation8], 0 }
   0x5   :  { %18 = vsyncpa [#allocation6], 0 }
   0x6   :  { %19 = vsyncpa [#allocation11], 0  ;;  %s914_s29 = smov [#allocation4]   ;;  %s915_s9 = smov [#allocation7]  }
   0x7   :  { %s26_s30 = sshll.u32 %s914_s29, 4  ;;  %s37_s10 = sshll.u32 %s915_s9, 4  ;;  %s27_s30 = int_to_ptr.vmem [resolvable:$true] %s26_s30  ;;  %s972_s10 = int_to_ptr.vmem [resolvable:$true] %s37_s10 }
   0x8   :  { %s818_s13 = scalar_lea.hbm %s1118_s0, 128 }
   0x9   :  { %p819_p0 = scmp.ne.s32.totalorder %s1118_s0, %s818_s13  ;;  %p822_p1 = scmp.lt.u32.totalorder %s818_s13, %s1118_s0 }
   0xb   :  { %p824_p2 = pnand %p822_p1, %p819_p0 }
   0xd   :  { %827 = shalt.err (!%p824_p2)
}
   0xe   :  { %s828_s17 = scalar_lea.vmem %s27_s30, 128  ;;  %p833_p4 = scmp.lt.s32.totalorder %s27_s30, %s27_s30 }
   0xf   :  { %p829_p3 = scmp.ne.s32.totalorder %s27_s30, %s828_s17  ;;  %p834_p5 = scmp.lt.s32.totalorder %s828_s17, %s828_s17 }
  0x11   :  { %p835_p6 = por %p834_p5, %p833_p4 }
  0x13   :  { %p836_p7 = pnand %p835_p6, %p829_p3 }
  0x15   :  { %839 = shalt.err (!%p836_p7)
}
  0x16   :  { %29 = dma.hbm_to_vmem [thread:$0]  %s1118_s0, 128, %s27_s30, [#allocation5]  }
  0x17   :  { %s840_s22 = scalar_lea.hbm %s1120_s2, 256 }
  0x18   :  { %p841_p8 = scmp.ne.s32.totalorder %s1120_s2, %s840_s22  ;;  %p844_p9 = scmp.lt.u32.totalorder %s840_s22, %s1120_s2 }
  0x1a   :  { %p846_p10 = pnand %p844_p9, %p841_p8 }
  0x1c   :  { %849 = shalt.err (!%p846_p10)
}
  0x1d   :  { %s850_s27 = scalar_lea.vmem %s972_s10, 256  ;;  %p855_p12 = scmp.lt.s32.totalorder %s972_s10, %s972_s10 }
  0x1e   :  { %p851_p11 = scmp.ne.s32.totalorder %s972_s10, %s850_s27  ;;  %p856_p13 = scmp.lt.s32.totalorder %s850_s27, %s850_s27 }
  0x20   :  { %p857_p0 = por %p856_p13, %p855_p12 }
  0x22   :  { %p858_p1 = pnand %p857_p0, %p851_p11 }
  0x24   :  { %861 = shalt.err (!%p858_p1)
}
  0x25   :  { %s916_s0 = smov 128   ;;  %s917_s28 = smov 8  }
  0x26   :  { %43 = dma.hbm_to_vmem [thread:$0]  %s1120_s2, 256, %s972_s10, [#allocation8], %s916_s0, %s916_s0, %s917_s28  }
  0x27   :  { %906 = dma.done.wait [#allocation5], 128  }
  0x28   :  { %907 = vsyncadd [#allocation5], 4294967168 }
  0x29   :  { %908 = dma.done.wait [#allocation8], 256  }
  0x2a   :  { %909 = vsyncadd [#allocation8], 4294967040  ;;  %v918_v1 = vmov 0.0|0.0   ;;  %vm919_vm0 = vmmov 0   ;;  %v920_v2 = vmov 0.0   ;;  %v60_v3 = vld [vmem:[#allocation7] sm:$0xff] }
  0x2b   :  { %786 = vmatprep.subr.bf16.mxu0 %v918_v1  ;;  %714 = vmatprep.mubr.msk.f32.mxu0 %vm919_vm0, %v920_v2  ;;  %v61_v4 = vld [vmem:[#allocation7 + $0x8] sm:$0xff]  ;;  %v59_v7 = vld [vmem:[#allocation4] sm:$0xff]  ;;  %vm69_vm1 = vcmask 130048   ;;  %vm143_vm2 = vcmask 261120   ;;  %vm209_vm3 = vcmask 253952   ;;  %s922_s15 = smov [#allocation10]  }
  0x2c   :  { %717 = vmatprep.subr.bf16.mxu1 %v920_v2  ;;  %721 = vmatprep.mubr.msk.bf16.mxu1 %vm919_vm0, %v920_v2  ;;  %v787_v5 = vpack.c.bf16 %v61_v4, %v60_v3  ;;  %v1011_v6 = vld [vmem:[%s1121_s3] sm:$0xff]   ;;  %v1017_v8 = vld [vmem:[%s1121_s3 + $0x8] sm:$0xff]   ;;  %s653_s6 = sshll.u32 %s922_s15, 4  ;;  %s654_s6 = int_to_ptr.vmem [resolvable:$true] %s653_s6 }
  0x2d   :  { %718 = vmatpush3.bf16.msra.mxu1 %v1011_v6  ;;  %v149_v9 = vld [vmem:[%s1119_s1] sm:$0x1]  ;;  %s862_s16 = scalar_lea.vmem %s654_s6, 128  ;;  %p867_p3 = scmp.lt.s32.totalorder %s654_s6, %s654_s6 }
  0x2e   :  { %788 = vmatpush3.bf16.msra.mxu0 %v787_v5  ;;  %719 = vmatprep.subr.bf16.mxu1 %v920_v2  ;;  %v151_v10 = vpack.c.bf16 %v149_v9, %v149_v9  ;;  %v667_v11 = vld [vmem:[%s1122_s4] ss:$0 sm:$0xff]  ;;  %v921_v9 = vmov 0   ;;  %p863_p2 = scmp.ne.s32.totalorder %s654_s6, %s862_s16  ;;  %p868_p4 = scmp.lt.s32.totalorder %s862_s16, %s862_s16 }
  0x2f   :  { %725 = vmatprep.subr.bf16.mxu0 %v920_v2  ;;  %799 = vset.pattern.permute.xlu0 %v921_v9 }
  0x30   :  { %p869_p5 = por %p868_p4, %p867_p3 }
  0x31   :  { %715 = vmatmul.mubr.msk.f32.vlgmr.msra.gmra.mrb[0].mxu0 %vm69_vm1, %v59_v7  ;;  %720 = vmatpush3.bf16.msra.mxu1 %v1017_v8 }
  0x32   :  { %726 = vmatpush3.bf16.msra.mxu0 %v1011_v6  ;;  %729 = vmatprep.mubr.msk.bf16.mxu0 %vm919_vm0, %v920_v2  ;;  %p870_p6 = pnand %p869_p5, %p863_p2 }
  0x33   :  { %727 = vmatprep.subr.bf16.mxu0 %v920_v2  ;;  %733 = vmatprep.subr.bf16.mxu1 %v920_v2 }
  0x34   :  { %722 = vmatmul.mubr.msk.bf16.vlgmr.msra.gmra.mrb[0].mxu1 %vm143_vm2, %v151_v10 }
  0x35   :  { %734 = vmatpush3.bf16.msra.mxu1 %v1011_v6  ;;  %737 = vmatprep.mubr.msk.bf16.mxu1 %vm919_vm0, %v920_v2 }
  0x36   :  { %728 = vmatpush3.bf16.msra.mxu0 %v1017_v8  ;;  %735 = vmatprep.subr.bf16.mxu1 %v920_v2 }
  0x37   :  { %741 = vmatprep.subr.bf16.mxu0 %v920_v2 }
  0x39   :  { %736 = vmatpush3.bf16.msra.mxu1 %v1017_v8 }
  0x3a   :  { %749 = vmatprep.subr.bf16.mxu1 %v920_v2 }
 0x104   :  { %v139_v12 = vpop.f32.mrb[0].mxu0 }
 0x105   :  { %v140_v13 = vadd.f32 %v667_v11, %v139_v12  ;;  %v716_v14 = vpop.f32.mrb[1].mxu0 }
 0x107   :  { %144 = vst.msk [vmem:[#allocation2] sm:$0xff] %vm143_vm2, %v140_v13  ;;  %v201_v15 = vpop.f32.mrb[0].mxu1 }
 0x108   :  { %v723_v16 = vpop.f32.mrb[1].mxu1 }
 0x109   :  { %v204_v17 = vpop.f32.mrb[2].mxu1 }
 0x10a   :  { %v724_v18 = vpop.f32.mrb[3].mxu1  ;;  %v548_v17 = vld [vmem:[%s1123_s5] sm:$0x1] }
 0x10e   :  { %v150_v19 = vld [vmem:[#allocation2] sm:$0x1]  ;;  %v211_v23 = vld [vmem:[#allocation2 + $0x1] sm:$0x1]  ;;  %v259_v31 = vld [vmem:[#allocation2 + $0x2] sm:$0x1] }
 0x10f   :  { %v207_v20 = vadd.f32 %v201_v15, %v150_v19  ;;  %v307_v39 = vld [vmem:[#allocation2 + $0x3] sm:$0x1]  ;;  %v355_v47 = vld [vmem:[#allocation2 + $0x4] sm:$0x1]  ;;  %v403_v55 = vld [vmem:[#allocation2 + $0x5] sm:$0x1] }
 0x110   :  { %v451_v63 = vld [vmem:[#allocation2 + $0x6] sm:$0x1]  ;;  %v499_v10 = vld [vmem:[#allocation2 + $0x7] sm:$0x1] }
 0x111   :  { %802 = vtanh.f32 %v207_v20 }
 0x11b   :  { %v803_v21 = vpop.eup %802 }
 0x11c   :  { %210 = vst.msk [vmem:[#allocation10] sm:$0x1] %vm209_vm3, %v803_v21  ;;  %v212_v22 = vpack.c.bf16 %v803_v21, %v803_v21 }
 0x11e   :  { %730 = vmatmul.mubr.msk.bf16.vlgmr.msra.gmra.mrb[4].mxu0 %vm143_vm2, %v212_v22 }
 0x11f   :  { %742 = vmatpush3.bf16.msra.mxu0 %v1011_v6  ;;  %745 = vmatprep.mubr.msk.bf16.mxu0 %vm919_vm0, %v920_v2 }
 0x120   :  { %743 = vmatprep.subr.bf16.mxu0 %v920_v2 }
 0x123   :  { %744 = vmatpush3.bf16.msra.mxu0 %v1017_v8 }
 0x124   :  { %757 = vmatprep.subr.bf16.mxu0 %v920_v2 }
 0x1f1   :  { %v250_v24 = vpop.f32.mrb[4].mxu0 }
 0x1f2   :  { %v256_v25 = vadd.f32 %v250_v24, %v211_v23  ;;  %v731_v26 = vpop.f32.mrb[5].mxu0 }
 0x1f3   :  { %v253_v27 = vpop.f32.mrb[6].mxu0 }
 0x1f4   :  { %804 = vtanh.f32 %v256_v25  ;;  %v732_v28 = vpop.f32.mrb[7].mxu0 }
 0x1fe   :  { %v805_v29 = vpop.eup %804 }
 0x1ff   :  { %258 = vst.msk [vmem:[#allocation10 + $0x1] sm:$0x1] %vm209_vm3, %v805_v29  ;;  %v260_v30 = vpack.c.bf16 %v805_v29, %v805_v29 }
 0x201   :  { %738 = vmatmul.mubr.msk.bf16.vlgmr.msra.gmra.mrb[4].mxu1 %vm143_vm2, %v260_v30 }
 0x202   :  { %750 = vmatpush3.bf16.msra.mxu1 %v1011_v6  ;;  %753 = vmatprep.mubr.msk.bf16.mxu1 %vm919_vm0, %v920_v2 }
 0x203   :  { %751 = vmatprep.subr.bf16.mxu1 %v920_v2 }
 0x206   :  { %752 = vmatpush3.bf16.msra.mxu1 %v1017_v8 }
 0x207   :  { %765 = vmatprep.subr.bf16.mxu1 %v920_v2 }
 0x2d4   :  { %v298_v32 = vpop.f32.mrb[4].mxu1 }
 0x2d5   :  { %v304_v33 = vadd.f32 %v298_v32, %v259_v31  ;;  %v739_v34 = vpop.f32.mrb[5].mxu1 }
 0x2d6   :  { %v301_v35 = vpop.f32.mrb[6].mxu1 }
 0x2d7   :  { %806 = vtanh.f32 %v304_v33  ;;  %v740_v36 = vpop.f32.mrb[7].mxu1 }
 0x2e1   :  { %v807_v37 = vpop.eup %806 }
 0x2e2   :  { %306 = vst.msk [vmem:[#allocation10 + $0x2] sm:$0x1] %vm209_vm3, %v807_v37  ;;  %v308_v38 = vpack.c.bf16 %v807_v37, %v807_v37 }
 0x2e4   :  { %746 = vmatmul.mubr.msk.bf16.vlgmr.msra.gmra.mrb[8].mxu0 %vm143_vm2, %v308_v38 }
 0x2e5   :  { %758 = vmatpush3.bf16.msra.mxu0 %v1011_v6  ;;  %761 = vmatprep.mubr.msk.bf16.mxu0 %vm919_vm0, %v920_v2 }
 0x2e6   :  { %759 = vmatprep.subr.bf16.mxu0 %v920_v2 }
 0x2e9   :  { %760 = vmatpush3.bf16.msra.mxu0 %v1017_v8 }
 0x2ea   :  { %773 = vmatprep.subr.bf16.mxu0 %v920_v2 }
 0x3b7   :  { %v346_v40 = vpop.f32.mrb[8].mxu0 }
 0x3b8   :  { %v352_v41 = vadd.f32 %v346_v40, %v307_v39  ;;  %v747_v42 = vpop.f32.mrb[9].mxu0 }
 0x3b9   :  { %v349_v43 = vpop.f32.mrb[10].mxu0 }
 0x3ba   :  { %808 = vtanh.f32 %v352_v41  ;;  %v748_v44 = vpop.f32.mrb[11].mxu0 }
 0x3c4   :  { %v809_v45 = vpop.eup %808 }
 0x3c5   :  { %354 = vst.msk [vmem:[#allocation10 + $0x3] sm:$0x1] %vm209_vm3, %v809_v45  ;;  %v356_v46 = vpack.c.bf16 %v809_v45, %v809_v45 }
 0x3c7   :  { %754 = vmatmul.mubr.msk.bf16.vlgmr.msra.gmra.mrb[8].mxu1 %vm143_vm2, %v356_v46 }
 0x3c8   :  { %766 = vmatpush3.bf16.msra.mxu1 %v1011_v6  ;;  %769 = vmatprep.mubr.msk.bf16.mxu1 %vm919_vm0, %v920_v2 }
 0x3c9   :  { %767 = vmatprep.subr.bf16.mxu1 %v920_v2 }
 0x3cc   :  { %768 = vmatpush3.bf16.msra.mxu1 %v1017_v8 }
 0x3cd   :  { %781 = vmatprep.subr.mxu1 %v920_v2 }
 0x49a   :  { %v394_v48 = vpop.f32.mrb[8].mxu1 }
 0x49b   :  { %v400_v49 = vadd.f32 %v394_v48, %v355_v47  ;;  %v755_v50 = vpop.f32.mrb[9].mxu1 }
 0x49c   :  { %v397_v51 = vpop.f32.mrb[10].mxu1 }
 0x49d   :  { %810 = vtanh.f32 %v400_v49  ;;  %v756_v52 = vpop.f32.mrb[11].mxu1 }
 0x4a7   :  { %v811_v53 = vpop.eup %810 }
 0x4a8   :  { %402 = vst.msk [vmem:[#allocation10 + $0x4] sm:$0x1] %vm209_vm3, %v811_v53  ;;  %v404_v54 = vpack.c.bf16 %v811_v53, %v811_v53 }
 0x4aa   :  { %762 = vmatmul.mubr.msk.bf16.vlgmr.msra.gmra.mrb[12].mxu0 %vm143_vm2, %v404_v54 }
 0x4ab   :  { %774 = vmatpush3.bf16.msra.mxu0 %v1011_v6  ;;  %777 = vmatprep.mubr.msk.bf16.mxu0 %vm919_vm0, %v920_v2 }
 0x4ac   :  { %775 = vmatprep.subr.bf16.mxu0 %v920_v2 }
 0x4af   :  { %776 = vmatpush3.bf16.msra.mxu0 %v1017_v8  ;;  %v549_v8 = vld [vmem:[#allocation3] sm:$0x1] }
 0x4b0   :  { %552 = vperm.xlu0 %799, %v549_v8  }
 0x57d   :  { %v442_v56 = vpop.f32.mrb[12].mxu0 }
 0x57e   :  { %v448_v57 = vadd.f32 %v442_v56, %v403_v55  ;;  %v763_v58 = vpop.f32.mrb[13].mxu0 }
 0x57f   :  { %v445_v59 = vpop.f32.mrb[14].mxu0 }
 0x580   :  { %812 = vtanh.f32 %v448_v57  ;;  %v764_v60 = vpop.f32.mrb[15].mxu0 }
 0x58a   :  { %v813_v61 = vpop.eup %812 }
 0x58b   :  { %450 = vst.msk [vmem:[#allocation10 + $0x5] sm:$0x1] %vm209_vm3, %v813_v61  ;;  %v452_v62 = vpack.c.bf16 %v813_v61, %v813_v61 }
 0x58d   :  { %770 = vmatmul.mubr.msk.bf16.vlgmr.msra.gmra.mrb[12].mxu1 %vm143_vm2, %v452_v62 }
 0x58e   :  { %783 = vmatprep.mubr.msk.f32.mxu1 %vm919_vm0, %v920_v2 }
 0x660   :  { %v490_v0 = vpop.f32.mrb[12].mxu1 }
 0x661   :  { %v496_v1 = vadd.f32 %v490_v0, %v451_v63  ;;  %v771_v3 = vpop.f32.mrb[13].mxu1 }
 0x662   :  { %v493_v4 = vpop.f32.mrb[14].mxu1 }
 0x663   :  { %814 = vtanh.f32 %v496_v1  ;;  %v772_v5 = vpop.f32.mrb[15].mxu1 }
 0x66d   :  { %v815_v6 = vpop.eup %814 }
 0x66e   :  { %498 = vst.msk [vmem:[#allocation10 + $0x6] sm:$0x1] %vm209_vm3, %v815_v6  ;;  %v500_v7 = vpack.c.bf16 %v815_v6, %v815_v6 }
 0x670   :  { %778 = vmatmul.mubr.msk.bf16.vlgmr.msra.gmra.mrb[16].mxu0 %vm143_vm2, %v500_v7 }
 0x743   :  { %v538_v11 = vpop.f32.mrb[16].mxu0 }
 0x744   :  { %v544_v2 = vadd.f32 %v538_v11, %v499_v10  ;;  %v779_v12 = vpop.f32.mrb[17].mxu0 }
 0x745   :  { %v541_v13 = vpop.f32.mrb[18].mxu0 }
 0x746   :  { %816 = vtanh.f32 %v544_v2  ;;  %v780_v14 = vpop.f32.mrb[19].mxu0 }
 0x750   :  { %v817_v15 = vpop.eup %816 }
 0x751   :  { %546 = vst.msk [vmem:[#allocation10 + $0x7] sm:$0x1] %vm209_vm3, %v817_v15 }
 0x758   :  { %v547_v16 = vld [vmem:[#allocation10] sm:$0xff] }
 0x759   :  { %782 = vmatpush3.xpose.msk.msra.mxu1 %vm143_vm2, %v547_v16 }
 0x75c   :  { %784 = vmatmul.mubr.msk.f32.vlgmr.msra.gmra.mrb[16].mxu1 %vm143_vm2, %v548_v17 }
 0x75d   :  { %873 = shalt.err (!%p870_p6)
}
 0x75e   :  { %s874_s19 = scalar_lea.hbm %s1126_s8, 128 }
 0x75f   :  { %p875_p7 = scmp.ne.s32.totalorder %s1126_s8, %s874_s19  ;;  %p878_p8 = scmp.lt.u32.totalorder %s874_s19, %s1126_s8 }
 0x761   :  { %p880_p9 = pnand %p878_p8, %p875_p7 }
 0x763   :  { %883 = shalt.err (!%p880_p9)
}
 0x764   :  { %656 = dma.vmem_to_hbm [thread:$0]  %s654_s6, 128, %s1126_s8, [#allocation11]   ;;  %v555_v18 = vlaneseq  ;;  %v553_v21 = vpop.permute.xlu0 %552  ;;  %vm635_vm4 = vcmask 57344  }
 0x765   :  { %s923_s25 = smov [#allocation9]  }
 0x766   :  { %v556_v19 = vshrl.u32 %v555_v18, 7  ;;  %s643_s26 = sshll.u32 %s923_s25, 4  ;;  %s644_s26 = int_to_ptr.vmem [resolvable:$true] %s643_s26 }
 0x767   :  { %s884_s27 = scalar_lea.vmem %s644_s26, 16  ;;  %s888_s0 = scalar_lea.vmem %s644_s26, 32 }
 0x768   :  { %v557_v20 = vsub.s32 0, %v556_v19  ;;  %p885_p10 = scmp.ne.s32.totalorder %s644_s26, %s884_s27  ;;  %p889_p11 = scmp.lt.s32.totalorder %s644_s26, %s644_s26 }
 0x769   :  { %p890_p12 = scmp.lt.s32.totalorder %s888_s0, %s884_s27 }
 0x76a   :  { %v558_v22 = vrot.slane %v553_v21, %v557_v20 }
 0x76b   :  { %p891_p13 = por %p890_p12, %p889_p11 }
 0x76d   :  { %p892_p0 = pnand %p891_p13, %p885_p10 }
 0x82f   :  { %v631_v23 = vpop.f32.mrb[16].mxu1 }
 0x830   :  { %v632_v24 = vadd.f32 %v631_v23, %v558_v22  ;;  %v785_v25 = vpop.f32.mrb[17].mxu1 }
 0x832   :  { %636 = vst.msk [vmem:[#allocation9] sm:$0x1] %vm635_vm4, %v632_v24 }
 0x833   :  { %895 = shalt.err (!%p892_p0)
}
 0x834   :  { %s896_s29 = scalar_lea.hbm %s1125_s7, 16 }
 0x835   :  { %p897_p1 = scmp.ne.s32.totalorder %s1125_s7, %s896_s29  ;;  %p900_p2 = scmp.lt.u32.totalorder %s896_s29, %s1125_s7 }
 0x837   :  { %p902_p3 = pnand %p900_p2, %p897_p1 }
 0x839   :  { %905 = shalt.err (!%p902_p3)
}
 0x83a   :  { %646 = dma.vmem_to_hbm [thread:$0]  %s644_s26, 16, %s1125_s7, [#allocation6]  }
 0x83b   :  { %910 = dma.done.wait [#allocation6], 16  }
 0x83c   :  { %911 = vsyncadd [#allocation6], 4294967280 }
 0x83d   :  { %912 = dma.done.wait [#allocation11], 128  }
 0x83e   :  { %913 = vsyncadd [#allocation11], 4294967168 }
 0x83f   :  { %663 = vsyncpa [#allocation5], 1 }
 0x840   :  { %664 = vsyncpa [#allocation8], 1 }
 0x841   :  { %665 = vsyncpa [#allocation6], 1 }
 0x842   :  { %666 = vsyncpa [#allocation11], 1 }

</bundles_post_ra>
